<compile_context>
chip_gen: v5e
topology: v5e:2x2
jax: 0.10.0
libtpu: 0.0.40
codegen_flags: <defaults>
</compile_context>

<pallas_src>
import functools

import jax
import jax.numpy as jnp
from jax.experimental import pallas as pl
from jax.experimental.pallas import tpu as pltpu


def _graph_attention_kernel(x_ref, wt_ref, b_ref, o_ref, *, nq, nk):
    # x_ref: (Bt, Nq+2Nk, D) = stacked [q; k; v] per batch
    # wt_ref: (D, D) == W.T (resident), b_ref: (1, D) (resident)
    # o_ref: (Bt, Nq, D)
    bt, m, d = x_ref.shape
    eps = jnp.float32(1e-8)

    # ---- Fused shared linear projection: one MXU matmul for q, k and v -----
    x2 = x_ref[...].reshape(bt * m, d)
    proj = jnp.dot(x2, wt_ref[...], preferred_element_type=jnp.float32)
    proj = proj + b_ref[...]
    proj = proj.reshape(bt, m, d)

    # Static slices at sublane-aligned offsets (Nq, Nk multiples of 8 here).
    qp = proj[:, :nq, :]                # (bt, nq, d)
    kp = proj[:, nq:nq + nk, :]         # (bt, nk, d)
    vp = proj[:, nq + nk:, :]           # (bt, nk, d)

    # ---- batch_cos_sim: same op ordering as the PyTorch reference ----------
    dots = jnp.einsum("bqd,bkd->bqk", qp, kp,
                      preferred_element_type=jnp.float32)         # (bt,nq,nk)
    q_norm = jnp.sqrt(jnp.sum(qp * qp, axis=-1, keepdims=True))   # (bt,nq,1)
    k_norm = jnp.sqrt(jnp.sum(kp * kp, axis=-1))[:, None, :]      # (bt,1,nk)
    sim = dots / (q_norm * k_norm + eps)

    # ---- Row normalization + aggregation ------------------------------------
    # EXACT division: sum of cosine similarities can be near zero, so any
    # approximate reciprocal error is hugely amplified (the previous bug).
    row_sum = jnp.sum(sim, axis=-1, keepdims=True)                # (bt,nq,1)
    edge_w = sim / (row_sum + eps)
    edge = jnp.einsum("bqk,bkd->bqd", edge_w, vp,
                      preferred_element_type=jnp.float32)         # (bt,nq,d)
    o_ref[...] = edge.astype(o_ref.dtype)

    # NOTE: for large Nq/Nk, stream the Nk axis (running row_sum + accumulated
    # sim@vp) so the (nq, nk) sim block never exceeds v7x's 64 MiB VMEM, and
    # cast the matmul operands to bf16; not needed at these node counts.


def graph_attention(q_node, k_node, v_node, weight, bias):
    """q_node: [B, Nq, D], k_node/v_node: [B, Nk, D].

    weight: [D, D] (PyTorch nn.Linear weight), bias: [D].
    Returns edge_feature: [B, Nq, D].
    """
    B, Nq, D = q_node.shape
    Nk = k_node.shape[1]
    M = Nq + 2 * Nk

    # Wrapper-side stacking: one input DMA instead of three, no in-kernel
    # concatenate.  (XLA does this concat once, outside the kernel.)
    x = jnp.concatenate([q_node, k_node, v_node], axis=1)   # (B, M, D)
    w_t = weight.T                                           # x @ W.T (nn.Linear)
    b2 = bias.reshape(1, D)

    # Split the batch across grid steps only when per-step work clearly
    # exceeds the ~0.35 us/step overhead; at small B/N/D a multi-step grid is
    # pure overhead on single-TC v5e/v6e and gains nothing on v7x either.
    big_enough = (B % 2 == 0) and (B * M * D >= (1 << 16))
    grid_steps = 2 if big_enough else 1
    bt = B // grid_steps

    flops = 2 * B * M * D * D + 4 * B * Nq * Nk * D
    bytes_accessed = 4 * (B * M * D + D * D + D + B * Nq * D)
    cost = pl.CostEstimate(flops=flops,
                           transcendentals=B * (Nq + Nk),
                           bytes_accessed=bytes_accessed)

    kernel = functools.partial(_graph_attention_kernel, nq=Nq, nk=Nk)

    return pl.pallas_call(
        kernel,
        out_shape=jax.ShapeDtypeStruct((B, Nq, D), q_node.dtype),
        grid_spec=pltpu.PrefetchScalarGridSpec(
            num_scalar_prefetch=0,
            grid=(grid_steps,),
            in_specs=[
                pl.BlockSpec((bt, M, D), lambda g: (g, 0, 0)),   # stacked qkv
                pl.BlockSpec((D, D), lambda g: (0, 0)),          # weight resident
                pl.BlockSpec((1, D), lambda g: (0, 0)),          # bias resident
            ],
            out_specs=pl.BlockSpec((bt, Nq, D), lambda g: (g, 0, 0)),
        ),
        compiler_params=pltpu.CompilerParams(
            dimension_semantics=(("parallel",) if grid_steps > 1
                                 else ("arbitrary",)),
            vmem_limit_bytes=32 * 1024 * 1024),
        cost_estimate=cost,
    )(x, w_t, b2)


def graph_attention_ref(q_node, k_node, v_node, weight, bias):
    """Pure-JAX reference mirroring the PyTorch forward."""
    eps = 1e-8
    qp = q_node @ weight.T + bias
    kp = k_node @ weight.T + bias
    vp = v_node @ weight.T + bias
    q_norm = jnp.linalg.norm(qp, axis=2, keepdims=True)
    k_norm = jnp.linalg.norm(kp, axis=2, keepdims=True)
    sim = jnp.einsum("bqd,bkd->bqk", qp, kp)
    sim = sim / (jnp.einsum("bqi,bki->bqk", q_norm, k_norm) + eps)
    ew = sim / (jnp.sum(sim, axis=2, keepdims=True) + eps)
    return jnp.einsum("bqk,bkd->bqd", ew, vp)


if __name__ == "__main__":
    # Use the same (highest) matmul precision for the kernel and the reference
    # so the comparison isn't dominated by dot-precision policy differences.
    jax.config.update("jax_default_matmul_precision", "highest")

    key = jax.random.PRNGKey(0)
    B, Nq, Nk, D = 2, 8, 8, 32   # h_dim = 32

    k1, k2, k3, k4, k5 = jax.random.split(key, 5)
    q_node = jax.random.normal(k1, (B, Nq, D), dtype=jnp.float32)
    k_node = jax.random.normal(k2, (B, Nk, D), dtype=jnp.float32)
    v_node = jax.random.normal(k3, (B, Nk, D), dtype=jnp.float32)
    # Deterministic nn.Linear(h_dim, h_dim) params (uniform, torch-like scale).
    bound = 1.0 / jnp.sqrt(D)
    weight = jax.random.uniform(k4, (D, D), minval=-bound, maxval=bound,
                                dtype=jnp.float32)
    bias = jax.random.uniform(k5, (D,), minval=-bound, maxval=bound,
                              dtype=jnp.float32)

    out = graph_attention(q_node, k_node, v_node, weight, bias)
    out = jax.block_until_ready(out)

    ref = graph_attention_ref(q_node, k_node, v_node, weight, bias)
    assert out.shape == (B, Nq, D)
    assert not bool(jnp.any(jnp.isnan(out)))

    # The module divides by sum(cos_sim), which for this data is ~1e-2, so the
    # outputs reach O(100): comparing with a blind absolute tolerance is
    # meaningless.  Check error relative to the output magnitude instead; with
    # exact in-kernel division the observed relative error is ~1e-5.
    err = float(jnp.max(jnp.abs(out - ref)))
    scale = float(jnp.max(jnp.abs(ref)))
    assert err <= 2e-3 * max(scale, 1.0), (err, scale)

    print("KERNEL_OK")
</pallas_src>

<mosaic_0001>
module attributes {stable_mosaic.version = 11 : i64} {
  func.func @_graph_attention_kernel(%arg0: i32, %arg1: memref<2x24x32xf32, #tpu.memory_space<vmem>>, %arg2: memref<32x32xf32, #tpu.memory_space<vmem>>, %arg3: memref<1x32xf32, #tpu.memory_space<vmem>>, %arg4: memref<2x8x32xf32, #tpu.memory_space<vmem>>) attributes {dimension_semantics = [#tpu.dimension_semantics<arbitrary>], iteration_bounds = array<i64: 1>, scalar_prefetch = 0 : i64, scratch_operands = 0 : i64, tpu.core_type = #tpu.core_type<tc>, window_params = [{transform_indices = @transform_0, window_bounds = array<i64: 2, 24, 32>}, {pipeline_mode = #tpu.pipeline_mode<synchronous>, transform_indices = @transform_1, window_bounds = array<i64: 32, 32>}, {pipeline_mode = #tpu.pipeline_mode<synchronous>, transform_indices = @transform_2, window_bounds = array<i64: 1, 32>}, {transform_indices = @transform_3, window_bounds = array<i64: 2, 8, 32>}]} {
    %c0 = arith.constant 0 : index
    %c0_0 = arith.constant 0 : index
    %c0_1 = arith.constant 0 : index
    %0 = vector.load %arg1[%c0, %c0_0, %c0_1] : memref<2x24x32xf32, #tpu.memory_space<vmem>>, vector<2x24x32xf32>
    %1 = vector.shape_cast %0 : vector<2x24x32xf32> to vector<48x32xf32>
    %c0_2 = arith.constant 0 : index
    %c0_3 = arith.constant 0 : index
    %2 = vector.load %arg2[%c0_2, %c0_3] : memref<32x32xf32, #tpu.memory_space<vmem>>, vector<32x32xf32>
    %cst = arith.constant dense<0.000000e+00> : vector<48x32xf32>
    %3 = tpu.matmul %1, %2, %cst {dimension_numbers = #tpu.dot_dimension_numbers<[1], [0], [0], [1], [0, 0, 1, 1], [], []>, precision = #tpu.contract_precision<fp32>} : vector<48x32xf32>, vector<32x32xf32>, vector<48x32xf32> -> vector<48x32xf32>
    %c0_4 = arith.constant 0 : index
    %c0_5 = arith.constant 0 : index
    %4 = vector.load %arg3[%c0_4, %c0_5] : memref<1x32xf32, #tpu.memory_space<vmem>>, vector<1x32xf32>
    %5 = vector.broadcast %4 : vector<1x32xf32> to vector<48x32xf32>
    %6 = arith.addf %3, %5 : vector<48x32xf32>
    %7 = vector.shape_cast %6 : vector<48x32xf32> to vector<2x24x32xf32>
    %8 = vector.extract_strided_slice %7 {offsets = [0, 0, 0], sizes = [2, 8, 32], strides = [1, 1, 1]} : vector<2x24x32xf32> to vector<2x8x32xf32>
    %9 = vector.extract_strided_slice %7 {offsets = [0, 8, 0], sizes = [2, 8, 32], strides = [1, 1, 1]} : vector<2x24x32xf32> to vector<2x8x32xf32>
    %10 = vector.extract_strided_slice %7 {offsets = [0, 16, 0], sizes = [2, 8, 32], strides = [1, 1, 1]} : vector<2x24x32xf32> to vector<2x8x32xf32>
    "tpu.trace_start"() <{level = 10 : i32, message = "bqd,bkd->bqk"}> : () -> ()
    %cst_6 = arith.constant dense<0.000000e+00> : vector<2x8x8xf32>
    %11 = tpu.matmul %8, %9, %cst_6 {dimension_numbers = #tpu.dot_dimension_numbers<[2], [2], [1], [1], [0, 0, 0, 1, 1, 1], [0], [0]>, precision = #tpu.contract_precision<fp32>} : vector<2x8x32xf32>, vector<2x8x32xf32>, vector<2x8x8xf32> -> vector<2x8x8xf32>
    "tpu.trace_stop"() : () -> ()
    %12 = arith.mulf %8, %8 : vector<2x8x32xf32>
    %cst_7 = arith.constant dense<0.000000e+00> : vector<2x8xf32>
    %13 = vector.multi_reduction <add>, %12, %cst_7 [2] : vector<2x8x32xf32> to vector<2x8xf32>
    %14 = vector.shape_cast %13 : vector<2x8xf32> to vector<2x8x1xf32>
    %15 = math.sqrt %14 : vector<2x8x1xf32>
    %16 = arith.mulf %9, %9 : vector<2x8x32xf32>
    %cst_8 = arith.constant dense<0.000000e+00> : vector<2x8xf32>
    %17 = vector.multi_reduction <add>, %16, %cst_8 [2] : vector<2x8x32xf32> to vector<2x8xf32>
    %18 = math.sqrt %17 : vector<2x8xf32>
    %19 = vector.shape_cast %18 : vector<2x8xf32> to vector<2x1x8xf32>
    %20 = vector.broadcast %15 : vector<2x8x1xf32> to vector<2x8x8xf32>
    %21 = vector.broadcast %19 : vector<2x1x8xf32> to vector<2x8x8xf32>
    %22 = arith.mulf %20, %21 : vector<2x8x8xf32>
    %cst_9 = arith.constant 9.99999993E-9 : f32
    %23 = vector.broadcast %cst_9 : f32 to vector<2x8x8xf32>
    %24 = arith.addf %22, %23 : vector<2x8x8xf32>
    %25 = arith.divf %11, %24 : vector<2x8x8xf32>
    %cst_10 = arith.constant dense<0.000000e+00> : vector<2x8xf32>
    %26 = vector.multi_reduction <add>, %25, %cst_10 [2] : vector<2x8x8xf32> to vector<2x8xf32>
    %27 = vector.shape_cast %26 : vector<2x8xf32> to vector<2x8x1xf32>
    %cst_11 = arith.constant 9.99999993E-9 : f32
    %28 = vector.broadcast %cst_11 : f32 to vector<2x8x1xf32>
    %29 = arith.addf %27, %28 : vector<2x8x1xf32>
    %30 = vector.broadcast %29 : vector<2x8x1xf32> to vector<2x8x8xf32>
    %31 = arith.divf %25, %30 : vector<2x8x8xf32>
    "tpu.trace_start"() <{level = 10 : i32, message = "bqk,bkd->bqd"}> : () -> ()
    %cst_12 = arith.constant dense<0.000000e+00> : vector<2x8x32xf32>
    %32 = tpu.matmul %31, %10, %cst_12 {dimension_numbers = #tpu.dot_dimension_numbers<[2], [1], [1], [2], [0, 0, 0, 1, 1, 2], [0], [0]>, precision = #tpu.contract_precision<fp32>} : vector<2x8x8xf32>, vector<2x8x32xf32>, vector<2x8x32xf32> -> vector<2x8x32xf32>
    "tpu.trace_stop"() : () -> ()
    %c0_13 = arith.constant 0 : index
    %c0_14 = arith.constant 0 : index
    %c0_15 = arith.constant 0 : index
    %33 = vector.load %arg4[%c0_13, %c0_14, %c0_15] : memref<2x8x32xf32, #tpu.memory_space<vmem>>, vector<2x8x32xf32>
    tpu.vector_store %arg4[%c0_13, %c0_14, %c0_15], %32 {strides = array<i32>} : memref<2x8x32xf32, #tpu.memory_space<vmem>>, vector<2x8x32xf32>,
    return
  }
  func.func @transform_0(%arg0: i32) -> (i32, i32, i32) {
    %c0_i32 = arith.constant 0 : i32
    %c0_i32_0 = arith.constant 0 : i32
    %c0_i32_1 = arith.constant 0 : i32
    return %arg0, %c0_i32, %c0_i32_0 : i32, i32, i32
  }
  func.func @transform_1(%arg0: i32) -> (i32, i32) {
    %c0_i32 = arith.constant 0 : i32
    %c0_i32_0 = arith.constant 0 : i32
    %c0_i32_1 = arith.constant 0 : i32
    return %c0_i32, %c0_i32_0 : i32, i32
  }
  func.func @transform_2(%arg0: i32) -> (i32, i32) {
    %c0_i32 = arith.constant 0 : i32
    %c0_i32_0 = arith.constant 0 : i32
    %c0_i32_1 = arith.constant 0 : i32
    return %c0_i32, %c0_i32_0 : i32, i32
  }
  func.func @transform_3(%arg0: i32) -> (i32, i32, i32) {
    %c0_i32 = arith.constant 0 : i32
    %c0_i32_0 = arith.constant 0 : i32
    %c0_i32_1 = arith.constant 0 : i32
    return %arg0, %c0_i32, %c0_i32_0 : i32, i32, i32
  }
}

</mosaic_0001>

<bundles_post_ra>
// kernel: tpu_custom_call.1
= control target key start
LH: loop header
LB: loop body
LE: loop exit
PB: predicated region body
PF: predicated region fallthrough
CT: control target
= control target key end

     0   :  { %8 = vsyncpa [#allocation3], 0  ;;  %s1474_s0 = inlined_call_operand.hbm [shape: f32[2,24,32], index: 0, kind: input, shape index: {}]   ;;  %s1475_s1 = inlined_call_operand.hbm [shape: f32[32,32], index: 1, kind: input, shape index: {}]   ;;  %s1476_s2 = inlined_call_operand.vmem [shape: f32[1,32], index: 2, kind: input, shape index: {}]   ;;  %s1477_s3 = inlined_call_operand.hbm [shape: f32[2,8,32], index: 3, kind: output, shape index: {}]  }
   0x1   :  { %9 = vsyncpa [#allocation6], 0 }
   0x2   :  { %10 = vsyncpa [#allocation4], 0  ;;  %s15_s14 = sshll.u32 %s1474_s0, 4  ;;  %s1307_s15 = smov [#allocation2]   ;;  %s16_s14 = int_to_ptr.hbm [resolvable:$true] %s15_s14 }
   0x3   :  { %s17_s16 = sshll.u32 %s1307_s15, 4  ;;  %s28_s19 = sshll.u32 %s1475_s1, 4  ;;  %s18_s16 = int_to_ptr.vmem [resolvable:$true] %s17_s16  ;;  %s29_s19 = int_to_ptr.hbm [resolvable:$true] %s28_s19 }
   0x4   :  { %s1308_s20 = smov 128   ;;  %s1309_s21 = smov 8  }
   0x5   :  { %23 = dma.hbm_to_vmem [thread:$0]  %s16_s14, 768, %s18_s16, [#allocation3], %s1308_s20, %s1308_s20, %s1309_s21  }
   0x6   :  { %s1310_s22 = smov [#allocation5]  }
   0x7   :  { %s30_s23 = sshll.u32 %s1310_s22, 4  ;;  %s31_s23 = int_to_ptr.vmem [resolvable:$true] %s30_s23 }
   0x8   :  { %36 = dma.hbm_to_vmem [thread:$0]  %s29_s19, 512, %s31_s23, [#allocation6], %s1308_s20, %s1308_s20, %s1309_s21  }
   0x9   :  { %1301 = dma.done.wait [#allocation3], 768  }
   0xa   :  { %1302 = vsyncadd [#allocation3], 4294966528 }
   0xb   :  { %1303 = dma.done.wait [#allocation6], 512  }
   0xc   :  { %1304 = vsyncadd [#allocation6], 4294966784  ;;  %vm61_vm0 = vcmask 261120   ;;  %v56_v0 = vld [vmem:[#allocation5 + $0x18] sm:$0xff]  ;;  %v55_v1 = vld [vmem:[#allocation5 + $0x10] sm:$0xff]  ;;  %vm848_vm11 = vcmask 64512  }
   0xd   :  { %v54_v2 = vld [vmem:[#allocation5 + $0x8] sm:$0xff]  ;;  %v1344_v3 = vand.u32 4294901760, %v56_v0  ;;  %v1346_v4 = vand.u32 4294901760, %v55_v1  ;;  %v53_v6 = vld [vmem:[#allocation5] sm:$0xff]  ;;  %v47_v7 = vld [vmem:[#allocation2] sm:$0xff]  ;;  %s1193_s27 = sshll.u32 %s1477_s3, 4  ;;  %s1194_s27 = int_to_ptr.hbm [resolvable:$true] %s1193_s27 }
   0xe   :  { %v1348_v5 = vand.u32 4294901760, %v54_v2  ;;  %v48_v8 = vld [vmem:[#allocation2 + $0x8] sm:$0xff]  ;;  %v1350_v9 = vand.u32 4294901760, %v53_v6  ;;  %v63_v10 = vsel %vm61_vm0, %v47_v7, 0  ;;  %v49_v12 = vld [vmem:[#allocation2 + $0x10] sm:$0xff]  ;;  %v50_v38 = vld [vmem:[#allocation2 + $0x18] sm:$0xff] }
   0xf   :  { %v66_v11 = vsel %vm61_vm0, %v48_v8, 0  ;;  %93 = vmatpush.msra.mxu0 %v1344_v3  ;;  %v162_v13 = vsub.f32 %v56_v0, %v1344_v3  ;;  %v168_v14 = vsub.f32 %v55_v1, %v1346_v4  ;;  %278 = vmatpush.msra.mxu3 %v1344_v3  ;;  %v1359_v16 = vand.u32 4294901760, %v63_v10  ;;  %v51_v46 = vld [vmem:[#allocation2 + $0x20] sm:$0xff]  ;;  %v52_v53 = vld [vmem:[#allocation2 + $0x28] sm:$0xff] }
  0x10   :  { %v174_v15 = vsub.f32 %v54_v2, %v1348_v5  ;;  %v180_v17 = vsub.f32 %v53_v6, %v1350_v9  ;;  %v1362_v18 = vand.u32 4294901760, %v66_v11  ;;  %v69_v19 = vsel %vm61_vm0, %v49_v12, 0 }
  0x11   :  { %95 = vmatpush.msra.mxu0 %v1346_v4  ;;  %224 = vmatpush.msra.mxu2 %v162_v13  ;;  %v163_v20 = vand.u32 4294901760, %v162_v13  ;;  %v101_v21 = vsub.f32 %v63_v10, %v1359_v16  ;;  %v169_v22 = vand.u32 4294901760, %v168_v14  ;;  %v1371_v31 = vand.u32 4294901760, %v69_v19 }
  0x12   :  { %v175_v23 = vand.u32 4294901760, %v174_v15  ;;  %280 = vmatpush.msra.mxu3 %v1346_v4  ;;  %v181_v24 = vand.u32 4294901760, %v180_v17  ;;  %v109_v25 = vsub.f32 %v66_v11, %v1362_v18  ;;  %v72_v42 = vsel %vm61_vm0, %v50_v38, 0  ;;  %v1395_v11 = vld [vmem:[%s1476_s2] ss:$0 sm:$0xff]  ;;  %s1311_s2 = smov [#allocation7]  }
  0x13   :  { %97 = vmatpush.msra.mxu0 %v1348_v5  ;;  %227 = vmatpush.msra.mxu2 %v168_v14  ;;  %v164_v26 = vsub.f32 %v162_v13, %v163_v20  ;;  %v102_v27 = vand.u32 4294901760, %v101_v21  ;;  %v170_v28 = vsub.f32 %v168_v14, %v169_v22  ;;  %v117_v41 = vsub.f32 %v69_v19, %v1371_v31  ;;  %s1191_s24 = sshll.u32 %s1311_s2, 4  ;;  %s1192_s24 = int_to_ptr.vmem [resolvable:$true] %s1191_s24 }
  0x14   :  { %v176_v29 = vsub.f32 %v174_v15, %v175_v23  ;;  %282 = vmatpush.msra.mxu3 %v1348_v5  ;;  %v182_v30 = vsub.f32 %v180_v17, %v181_v24  ;;  %v110_v35 = vand.u32 4294901760, %v109_v25  ;;  %v124_v45 = vand.u32 4294901760, %v72_v42 }
  0x15   :  { %99 = vmatpush.msra.mxu0 %v1350_v9  ;;  %v165_v32 = vand.u32 4294901760, %v164_v26  ;;  %230 = vmatpush.msra.mxu2 %v174_v15  ;;  %v103_v33 = vsub.f32 %v101_v21, %v102_v27  ;;  %v171_v34 = vand.u32 4294901760, %v170_v28  ;;  %v118_v44 = vand.u32 4294901760, %v117_v41 }
  0x16   :  { %284 = vmatpush.msra.mxu3 %v1350_v9  ;;  %v177_v37 = vand.u32 4294901760, %v176_v29  ;;  %v183_v39 = vand.u32 4294901760, %v182_v30  ;;  %v111_v40 = vsub.f32 %v109_v25, %v110_v35  ;;  %v125_v48 = vsub.f32 %v72_v42, %v124_v45 }
  0x17   :  { %337 = vmatpush.msrb.mxu0 %v163_v20  ;;  %166 = vmatpush.msra.mxu1 %v165_v32  ;;  %v104_v36 = vand.u32 4294901760, %v103_v33  ;;  %v119_v47 = vsub.f32 %v117_v41, %v118_v44  ;;  %v75_v49 = vsel %vm61_vm0, %v51_v46, 0  ;;  %v78_v56 = vsel %vm61_vm0, %v52_v53, 0 }
  0x18   :  { %233 = vmatpush.msra.mxu2 %v180_v17  ;;  %288 = vmatmul.f32.vlgmr.msra.gmra.mxu3 %v102_v27  ;;  %v112_v43 = vand.u32 4294901760, %v111_v40  ;;  %v126_v51 = vand.u32 4294901760, %v125_v48  ;;  %v132_v52 = vand.u32 4294901760, %v75_v49  ;;  %v140_v59 = vand.u32 4294901760, %v78_v56 }
  0x19   :  { %236 = vmatmul.f32.vlgmr.msra.gmra.mxu2 %v101_v21  ;;  %105 = vmatmul.f32.vlgmr.msra.gmra.mxu0 %v104_v36  ;;  %v120_v50 = vand.u32 4294901760, %v119_v47 }
  0x1a   :  { %172 = vmatpush.msra.mxu1 %v171_v34  ;;  %341 = vmatpush.msrb.mxu0 %v169_v22  ;;  %v127_v54 = vsub.f32 %v125_v48, %v126_v51  ;;  %v133_v55 = vsub.f32 %v75_v49, %v132_v52  ;;  %v141_v61 = vsub.f32 %v78_v56, %v140_v59 }
  0x1c   :  { %178 = vmatpush.msra.mxu1 %v177_v37  ;;  %345 = vmatpush.msrb.mxu0 %v175_v23  ;;  %v128_v57 = vand.u32 4294901760, %v127_v54  ;;  %v134_v58 = vand.u32 4294901760, %v133_v55  ;;  %v142_v63 = vand.u32 4294901760, %v141_v61 }
  0x1e   :  { %184 = vmatpush.msra.mxu1 %v183_v39  ;;  %349 = vmatpush.msrb.mxu0 %v181_v24  ;;  %v135_v60 = vsub.f32 %v133_v55, %v134_v58  ;;  %v143_v0 = vsub.f32 %v141_v61, %v142_v63 }
  0x1f   :  { %186 = vmatmul.f32.vlgmr.msra.gmra.mxu1 %v1359_v16 }
  0x20   :  { %388 = vmatpush.msrb.mxu1 %v1344_v3  ;;  %294 = vmatmul.f32.gmra.mxu3 %v110_v35  ;;  %v136_v62 = vand.u32 4294901760, %v135_v60  ;;  %v144_v1 = vand.u32 4294901760, %v143_v0 }
  0x21   :  { %241 = vmatmul.f32.gmra.mxu2 %v109_v25  ;;  %113 = vmatmul.f32.gmra.mxu0 %v112_v43 }
  0x22   :  { %390 = vmatpush.msrb.mxu1 %v1346_v4 }
  0x24   :  { %392 = vmatpush.msrb.mxu1 %v1348_v5 }
  0x26   :  { %394 = vmatpush.msrb.mxu1 %v1350_v9 }
  0x27   :  { %190 = vmatmul.f32.gmra.mxu1 %v1362_v18 }
  0x28   :  { %300 = vmatmul.f32.gmra.mxu3 %v118_v44 }
  0x29   :  { %246 = vmatmul.f32.gmra.mxu2 %v117_v41  ;;  %121 = vmatmul.f32.gmra.mxu0 %v120_v50 }
  0x2f   :  { %194 = vmatmul.f32.gmra.mxu1 %v1371_v31 }
  0x30   :  { %306 = vmatmul.f32.gmra.mxu3 %v126_v51 }
  0x31   :  { %251 = vmatmul.f32.gmra.mxu2 %v125_v48  ;;  %129 = vmatmul.f32.gmra.mxu0 %v128_v57 }
  0x37   :  { %198 = vmatmul.f32.gmra.mxu1 %v124_v45 }
  0x38   :  { %312 = vmatmul.f32.gmra.mxu3 %v134_v58 }
  0x39   :  { %256 = vmatmul.f32.gmra.mxu2 %v133_v55  ;;  %137 = vmatmul.f32.gmra.mxu0 %v136_v62 }
  0x3f   :  { %202 = vmatmul.f32.gmra.mxu1 %v132_v52 }
  0x40   :  { %318 = vmatmul.f32.gmra.mxu3 %v142_v63 }
  0x41   :  { %261 = vmatmul.f32.gmra.mxu2 %v141_v61  ;;  %145 = vmatmul.f32.gmra.mxu0 %v144_v1 }
  0x47   :  { %206 = vmatmul.f32.gmra.mxu1 %v140_v59 }
  0x49   :  { %351 = vmatmul.f32.vlgmr.msrb.gmra.mxu0 %v1359_v16 }
  0x4f   :  { %396 = vmatmul.f32.vlgmr.msrb.gmra.mxu1 %v1359_v16 }
  0x51   :  { %355 = vmatmul.f32.gmra.mxu0 %v1362_v18 }
  0x57   :  { %400 = vmatmul.f32.gmra.mxu1 %v1362_v18 }
  0x59   :  { %359 = vmatmul.f32.gmra.mxu0 %v1371_v31 }
  0x5f   :  { %404 = vmatmul.f32.gmra.mxu1 %v1371_v31 }
  0x61   :  { %363 = vmatmul.f32.gmra.mxu0 %v124_v45 }
  0x67   :  { %408 = vmatmul.f32.gmra.mxu1 %v124_v45 }
  0x69   :  { %367 = vmatmul.f32.gmra.mxu0 %v132_v52 }
  0x6f   :  { %412 = vmatmul.f32.gmra.mxu1 %v132_v52 }
  0x71   :  { %371 = vmatmul.f32.gmra.mxu0 %v140_v59 }
  0x77   :  { %416 = vmatmul.f32.gmra.mxu1 %v140_v59 }
  0x96   :  { %v106_v2 = vpop.f32.mrf.mxu0 }
  0x97   :  { %v107_v14 = vadd.f32 %v1395_v11, %v106_v2 }
  0x9b   :  { %v289_v15 = vpop.f32.mrf.mxu3 }
  0x9c   :  { %v187_v3 = vpop.f32.mrf.mxu1  ;;  %v237_v12 = vpop.f32.mrf.mxu2 }
  0x9d   :  { %v188_v17 = vadd.f32 %v187_v3, %v107_v14 }
  0x9e   :  { %v114_v4 = vpop.f32.mrf.mxu0 }
  0x9f   :  { %v115_v20 = vadd.f32 %v1395_v11, %v114_v4  ;;  %v238_v21 = vadd.f32 %v237_v12, %v188_v17 }
  0xa1   :  { %v290_v24 = vadd.f32 %v289_v15, %v238_v21 }
  0xa3   :  { %v295_v23 = vpop.f32.mrf.mxu3 }
  0xa4   :  { %v191_v5 = vpop.f32.mrf.mxu1  ;;  %v242_v18 = vpop.f32.mrf.mxu2 }
  0xa5   :  { %v192_v25 = vadd.f32 %v191_v5, %v115_v20 }
  0xa6   :  { %v122_v6 = vpop.f32.mrf.mxu0 }
  0xa7   :  { %v123_v28 = vadd.f32 %v1395_v11, %v122_v6  ;;  %v243_v29 = vadd.f32 %v242_v18, %v192_v25 }
  0xa9   :  { %v296_v35 = vadd.f32 %v295_v23, %v243_v29 }
  0xab   :  { %v301_v37 = vpop.f32.mrf.mxu3 }
  0xac   :  { %v195_v7 = vpop.f32.mrf.mxu1  ;;  %v247_v31 = vpop.f32.mrf.mxu2 }
  0xad   :  { %v196_v36 = vadd.f32 %v195_v7, %v123_v28 }
  0xae   :  { %v130_v8 = vpop.f32.mrf.mxu0 }
  0xaf   :  { %v131_v42 = vadd.f32 %v1395_v11, %v130_v8  ;;  %v248_v43 = vadd.f32 %v247_v31, %v196_v36 }
  0xb1   :  { %v302_v51 = vadd.f32 %v301_v37, %v248_v43 }
  0xb3   :  { %v307_v57 = vpop.f32.mrf.mxu3 }
  0xb4   :  { %v199_v9 = vpop.f32.mrf.mxu1  ;;  %v252_v49 = vpop.f32.mrf.mxu2 }
  0xb5   :  { %v200_v52 = vadd.f32 %v199_v9, %v131_v42 }
  0xb6   :  { %v138_v10 = vpop.f32.mrf.mxu0 }
  0xb7   :  { %v139_v60 = vadd.f32 %v1395_v11, %v138_v10  ;;  %v253_v61 = vadd.f32 %v252_v49, %v200_v52 }
  0xb9   :  { %v308_v4 = vadd.f32 %v307_v57, %v253_v61 }
  0xbc   :  { %v203_v13 = vpop.f32.mrf.mxu1  ;;  %v257_v8 = vpop.f32.mrf.mxu2 }
  0xbd   :  { %v204_v5 = vadd.f32 %v203_v13, %v139_v60  ;;  %v313_v13 = vpop.f32.mrf.mxu3 }
  0xbe   :  { %v1398_v16 = vpop.f32.mrf.mxu0 }
  0xbf   :  { %v258_v14 = vadd.f32 %v257_v8, %v204_v5  ;;  %v147_v21 = vadd.f32 %v1395_v11, %v1398_v16 }
  0xc4   :  { %v1400_v19 = vpop.f32.mrf.mxu1 }
  0xc5   :  { %v319_v36 = vpop.f32.mrf.mxu3 }
  0xc6   :  { %v352_v22 = vpop.f32.mrf.mxu0 }
  0xc7   :  { %v353_v26 = vadd.f32 %v352_v22, %v290_v24  ;;  %v314_v24 = vadd.f32 %v313_v13, %v258_v14 }
  0xcc   :  { %v397_v27 = vpop.f32.mrf.mxu1 }
  0xcd   :  { %v398_v30 = vadd.f32 %v397_v27, %v353_v26  ;;  %v208_v27 = vadd.f32 %v1400_v19, %v147_v21 }
  0xce   :  { %v356_v33 = vpop.f32.mrf.mxu0 }
  0xcf   :  { %v421_v32 = vsel %vm61_vm0, %v398_v30, 0  ;;  %v357_v39 = vadd.f32 %v356_v33, %v296_v35  ;;  %v724_v63 = vmul.f32 %v398_v30, %v398_v30  ;;  %v262_v30 = vpop.f32.mrf.mxu2 }
  0xd0   :  { %v1405_v34 = vand.u32 4294901760, %v421_v32  ;;  %v263_v33 = vadd.f32 %v262_v30, %v208_v27 }
  0xd1   :  { %v726_v7 = vsel %vm61_vm0, %v724_v63, 0.0 }
  0xd2   :  { %v1408_v38 = vsub.f32 %v421_v32, %v1405_v34  ;;  %v320_v42 = vadd.f32 %v319_v36, %v263_v33 }
  0xd4   :  { %v401_v40 = vpop.f32.mrf.mxu1  ;;  %v445_v41 = vand.u32 4294901760, %v1408_v38 }
  0xd5   :  { %v402_v44 = vadd.f32 %v401_v40, %v357_v39 }
  0xd6   :  { %v360_v46 = vpop.f32.mrf.mxu0  ;;  %v446_v48 = vsub.f32 %v1408_v38, %v445_v41 }
  0xd7   :  { %v424_v45 = vsel %vm61_vm0, %v402_v44, 0  ;;  %v756_v47 = vmul.f32 %v402_v44, %v402_v44  ;;  %v361_v55 = vadd.f32 %v360_v46, %v302_v51 }
  0xd8   :  { %v441_v50 = vand.u32 4294901760, %v424_v45  ;;  %v447_v56 = vand.u32 4294901760, %v446_v48 }
  0xd9   :  { %v758_v53 = vsel %vm61_vm0, %v756_v47, 0.0 }
  0xda   :  { %v468_v54 = vsub.f32 %v424_v45, %v441_v50  ;;  %759 = vadd.xlane.f32.xlu0 %v758_v53  ;;  %442 = vmatpush.xpose.msrb.mxu2 %v441_v50 }
  0xdc   :  { %v405_v58 = vpop.f32.mrf.mxu1  ;;  %v469_v59 = vand.u32 4294901760, %v468_v54 }
  0xdd   :  { %v406_v62 = vadd.f32 %v405_v58, %v361_v55  ;;  %448 = vmatmul.f32.vlgmr.msrb.gmra.mxu2 %v447_v56 }
  0xde   :  { %495 = vmatpush.xpose.msra.mxu2 %v468_v54  ;;  %v470_v0 = vsub.f32 %v468_v54, %v469_v59  ;;  %v364_v2 = vpop.f32.mrf.mxu0 }
  0xdf   :  { %v1418_v1 = vand.u32 4294901760, %v406_v62  ;;  %v365_v10 = vadd.f32 %v364_v2, %v308_v4 }
  0xe0   :  { %v471_v3 = vand.u32 4294901760, %v470_v0 }
  0xe1   :  { %v1421_v6 = vsub.f32 %v406_v62, %v1418_v1  ;;  %906 = vmatpush.msra.mxu0 %v1418_v1 }
  0xe2   :  { %544 = vmatpush.xpose.msrb.mxu2 %v469_v59  ;;  %472 = vmatpush.xpose.msrb.mxu3 %v471_v3 }
  0xe3   :  { %727 = vadd.xlane.f32.xlu0 %v726_v7  ;;  %v933_v9 = vand.u32 4294901760, %v1421_v6 }
  0xe4   :  { %v409_v12 = vpop.f32.mrf.mxu1 }
  0xe5   :  { %v934_v15 = vsub.f32 %v1421_v6, %v933_v9  ;;  %v410_v17 = vadd.f32 %v409_v12, %v365_v10  ;;  %474 = vmatmul.f32.vlgmr.msrb.gmra.mxu3 %v1405_v34  ;;  %498 = vmatmul.f32.vlgmr.msra.gmra.mxu2 %v1408_v38 }
  0xe6   :  { %518 = vmatpush.xpose.msra.mxu3 %v441_v50  ;;  %1008 = vmatpush.msrb.mxu0 %v933_v9  ;;  %v368_v23 = vpop.f32.mrf.mxu0 }
  0xe7   :  { %v573_v18 = vsel %vm61_vm0, %v410_v17, 0  ;;  %v935_v20 = vand.u32 4294901760, %v934_v15  ;;  %v369_v26 = vadd.f32 %v368_v23, %v314_v24  ;;  %v725_v43 = vmul.f32 %v410_v17, %v410_v17 }
  0xe8   :  { %v595_v22 = vand.u32 4294901760, %v573_v18 }
  0xe9   :  { %936 = vmatpush.msra.mxu1 %v935_v20  ;;  %v729_v48 = vsel %vm61_vm0, %v725_v43, 0.0 }
  0xea   :  { %566 = vmatpush.xpose.msrb.mxu3 %v441_v50  ;;  %v596_v25 = vsub.f32 %v573_v18, %v595_v22 }
  0xeb   :  { %1030 = vmatpush.msrb.mxu1 %v1418_v1 }
  0xec   :  { %v597_v28 = vand.u32 4294901760, %v596_v25  ;;  %v413_v29 = vpop.f32.mrf.mxu1 }
  0xed   :  { %v414_v31 = vadd.f32 %v413_v29, %v369_v26  ;;  %522 = vmatmul.f32.vlgmr.msra.gmra.mxu3 %v445_v41  ;;  %546 = vmatmul.f32.vlgmr.msrb.gmra.mxu2 %v1405_v34 }
  0xee   :  { %v598_v32 = vsub.f32 %v596_v25, %v597_v28  ;;  %v372_v19 = vpop.f32.mrf.mxu0 }
  0xef   :  { %v576_v11 = vsel %vm61_vm0, %v414_v31, 0  ;;  %v757_v16 = vmul.f32 %v414_v31, %v414_v31  ;;  %v373_v44 = vadd.f32 %v372_v19, %v320_v42 }
  0xf0   :  { %v593_v35 = vand.u32 4294901760, %v576_v11  ;;  %v599_v40 = vand.u32 4294901760, %v598_v32 }
  0xf1   :  { %v761_v37 = vsel %vm61_vm0, %v757_v16, 0.0 }
  0xf2   :  { %v620_v39 = vsub.f32 %v576_v11, %v593_v35  ;;  %762 = vadd.xlane.f32.xlu1 %v761_v37  ;;  %594 = vmatpush.xpose.msra.mxu2 %v593_v35 }
  0xf4   :  { %v621_v38 = vand.u32 4294901760, %v620_v39  ;;  %v417_v41 = vpop.f32.mrf.mxu1 }
  0xf5   :  { %568 = vmatmul.f32.vlgmr.msrb.gmra.mxu3 %v1405_v34  ;;  %600 = vmatmul.f32.vlgmr.msra.gmra.mxu2 %v599_v40  ;;  %v418_v46 = vadd.f32 %v417_v41, %v373_v44 }
  0xf6   :  { %647 = vmatpush.xpose.msrb.mxu2 %v620_v39  ;;  %v622_v45 = vsub.f32 %v620_v39, %v621_v38 }
  0xf7   :  { %v1441_v49 = vand.u32 4294901760, %v418_v46 }
  0xf8   :  { %v623_v47 = vand.u32 4294901760, %v622_v45 }
  0xf9   :  { %v1445_v34 = vsub.f32 %v418_v46, %v1441_v49 }
  0xfa   :  { %696 = vmatpush.xpose.msra.mxu2 %v621_v38  ;;  %730 = vadd.xlane.f32.xlu1 %v729_v48 }
  0xfb   :  { %624 = vmatpush.xpose.msra.mxu3 %v623_v47  ;;  %v1082_v50 = vand.u32 4294901760, %v1445_v34 }
  0xfd   :  { %650 = vmatmul.f32.vlgmr.msrb.gmra.mxu2 %v596_v25  ;;  %v1083_v51 = vsub.f32 %v1445_v34, %v1082_v50 }
  0xfe   :  { %626 = vmatmul.f32.vlgmr.msra.gmra.mxu3 %v595_v22  ;;  %959 = vmatpush.msrb.mxu2 %v1421_v6 }
  0xff   :  { %670 = vmatpush.xpose.msrb.mxu3 %v593_v35  ;;  %v1084_v52 = vand.u32 4294901760, %v1083_v51 }
 0x103   :  { %718 = vmatpush.xpose.msra.mxu3 %v593_v35 }
 0x105   :  { %698 = vmatmul.f32.vlgmr.msra.gmra.mxu2 %v595_v22 }
 0x106   :  { %674 = vmatmul.f32.vlgmr.msrb.gmra.mxu3 %v597_v28  ;;  %1055 = vmatpush.msra.mxu2 %v1441_v49 }
 0x107   :  { %982 = vmatpush.msrb.mxu3 %v1418_v1  ;;  %v790_v1 = vlaneseq }
 0x109   :  { %v1453_v7 = vand.u32 127, %v790_v1 }
 0x10e   :  { %720 = vmatmul.f32.vlgmr.msra.gmra.mxu3 %v595_v22 }
 0x10f   :  { %1085 = vmatpush.msra.mxu3 %v1084_v52 }
 0x14d   :  { %v760_v53 = vpop.xlane.xlu0 %759 }
 0x14e   :  { %1213 = vrsqrt.f32 %v760_v53  ;;  %vm771_vm1 = vcmp.eq.f32.partialorder %v760_v53, inf  ;;  %v774_v6 = vand.u32 2147483648, %v760_v53  ;;  %vm773_vm2 = vcmp.eq.f32.partialorder %v760_v53, 0.0 }
 0x154   :  { %v1214_v54 = vpop.eup %1213 }
 0x155   :  { %v765_v55 = vmul.f32 %v1214_v54, %v760_v53 }
 0x156   :  { %v728_v56 = vpop.xlane.xlu0 %727 }
 0x157   :  { %1215 = vrsqrt.f32 %v728_v56  ;;  %v766_v57 = vmul.f32 %v1214_v54, %v765_v55  ;;  %vm739_vm3 = vcmp.eq.f32.partialorder %v728_v56, inf  ;;  %v742_v14 = vand.u32 2147483648, %v728_v56 }
 0x158   :  { %vm741_vm4 = vcmp.eq.f32.partialorder %v728_v56, 0.0 }
 0x159   :  { %v767_v58 = vmul.f32 0.5, %v766_v57 }
 0x15b   :  { %v768_v59 = vsub.f32 1.5, %v767_v58 }
 0x15d   :  { %v1216_v60 = vpop.eup %1215  ;;  %v769_v61 = vmul.f32 %v1214_v54, %v768_v59 }
 0x15e   :  { %v733_v62 = vmul.f32 %v1216_v60, %v728_v56 }
 0x15f   :  { %v770_v63 = vmul.f32 %v769_v61, %v760_v53 }
 0x160   :  { %v734_v0 = vmul.f32 %v1216_v60, %v733_v62  ;;  %v449_v3 = vpop.f32.mrf.mxu2 }
 0x161   :  { %v772_v4 = vsel %vm771_vm1, %v760_v53, %v770_v63 }
 0x162   :  { %v735_v2 = vmul.f32 0.5, %v734_v0  ;;  %v775_v10 = vsel %vm773_vm2, %v774_v6, %v772_v4 }
 0x163   :  { %v792_v17 = vperm.slane %v775_v10, %v1453_v7 }
 0x164   :  { %v736_v5 = vsub.f32 1.5, %v735_v2 }
 0x165   :  { %v763_v9 = vpop.xlane.xlu1 %762 }
 0x166   :  { %v737_v8 = vmul.f32 %v1216_v60, %v736_v5  ;;  %1217 = vrsqrt.f32 %v763_v9  ;;  %vm783_vm5 = vcmp.eq.f32.partialorder %v763_v9, inf  ;;  %v786_v47 = vand.u32 2147483648, %v763_v9 }
 0x167   :  { %vm785_vm8 = vcmp.eq.f32.partialorder %v763_v9, 0.0 }
 0x168   :  { %v738_v12 = vmul.f32 %v737_v8, %v728_v56  ;;  %v475_v15 = vpop.f32.mrf.mxu3  ;;  %v499_v21 = vpop.f32.mrf.mxu2 }
 0x169   :  { %v476_v29 = vadd.f32 %v475_v15, %v449_v3 }
 0x16a   :  { %v740_v13 = vsel %vm739_vm3, %v728_v56, %v738_v12 }
 0x16b   :  { %v743_v18 = vsel %vm741_vm4, %v742_v14, %v740_v13  ;;  %v500_v35 = vadd.f32 %v499_v21, %v476_v29 }
 0x16c   :  { %v814_v20 = vmul.f32 %v792_v17, %v743_v18  ;;  %v1218_v22 = vpop.eup %1217 }
 0x16d   :  { %v777_v24 = vmul.f32 %v1218_v22, %v763_v9  ;;  %v731_v25 = vpop.xlane.xlu1 %730 }
 0x16e   :  { %v816_v23 = vadd.f32 1e-08, %v814_v20  ;;  %1219 = vrsqrt.f32 %v731_v25  ;;  %vm751_vm12 = vcmp.eq.f32.partialorder %v731_v25, inf  ;;  %v754_v60 = vand.u32 2147483648, %v731_v25 }
 0x16f   :  { %v778_v26 = vmul.f32 %v1218_v22, %v777_v24  ;;  %vm753_vm13 = vcmp.eq.f32.partialorder %v731_v25, 0.0 }
 0x170   :  { %1221 = vrcp.f32 %v816_v23  ;;  %v523_v27 = vpop.f32.mrf.mxu3  ;;  %v547_v33 = vpop.f32.mrf.mxu2  ;;  %v829_v41 = vand.u32 2147483648, %v816_v23  ;;  %v827_v44 = vand.u32 2147483647, %v816_v23  ;;  %vm823_vm7 = vweird.f32 %v816_v23 }
 0x171   :  { %v779_v28 = vmul.f32 0.5, %v778_v26  ;;  %v524_v19 = vadd.f32 %v523_v27, %v500_v35 }
 0x172   :  { %v830_v53 = vor.u32 1.1754944e-38, %v829_v41  ;;  %vm828_vm10 = vcmp.eq.f32.partialorder %v827_v44, 8.507059e+37 }
 0x173   :  { %v780_v30 = vsub.f32 1.5, %v779_v28  ;;  %v548_v48 = vadd.f32 %v547_v33, %v524_v19 }
 0x174   :  { %v1220_v31 = vpop.eup %1219 }
 0x175   :  { %v781_v16 = vmul.f32 %v1218_v22, %v780_v30  ;;  %v745_v32 = vmul.f32 %v1220_v31, %v731_v25 }
 0x176   :  { %v1222_v11 = vpop.eup %1221 }
 0x177   :  { %v819_v36 = vmul.f32 %v1222_v11, %v816_v23  ;;  %v782_v37 = vmul.f32 %v781_v16, %v763_v9  ;;  %v746_v39 = vmul.f32 %v1220_v31, %v745_v32  ;;  %vm824_vm6 = vweird.f32 %v1222_v11 }
 0x178   :  { %v569_v40 = vpop.f32.mrf.mxu3  ;;  %vm825_vm9 = vmor %vm823_vm7, %vm824_vm6  ;;  %v601_v58 = vpop.f32.mrf.mxu2 }
 0x179   :  { %v820_v42 = vsub.f32 1.0, %v819_v36  ;;  %v747_v38 = vmul.f32 0.5, %v746_v39  ;;  %v784_v45 = vsel %vm783_vm5, %v763_v9, %v782_v37  ;;  %v570_v55 = vadd.f32 %v569_v40, %v548_v48 }
 0x17a   :  { %v787_v54 = vsel %vm785_vm8, %v786_v47, %v784_v45 }
 0x17b   :  { %v821_v43 = vmul.f32 %v1222_v11, %v820_v42  ;;  %v748_v46 = vsub.f32 1.5, %v747_v38  ;;  %v793_v63 = vperm.slane %v787_v54, %v1453_v7 }
 0x17d   :  { %v822_v51 = vadd.f32 %v1222_v11, %v821_v43  ;;  %v749_v52 = vmul.f32 %v1220_v31, %v748_v46 }
 0x17f   :  { %v826_v56 = vsel %vm825_vm9, %v1222_v11, %v822_v51  ;;  %v750_v57 = vmul.f32 %v749_v52, %v731_v25 }
 0x180   :  { %v831_v59 = vsel %vm828_vm10, %v830_v53, %v826_v56  ;;  %v651_v5 = vpop.f32.mrf.mxu2 }
 0x181   :  { %v627_v61 = vpop.f32.mrf.mxu3  ;;  %v832_v62 = vmul.f32 %v831_v59, %v570_v55  ;;  %v752_v0 = vsel %vm751_vm12, %v731_v25, %v750_v57 }
 0x182   :  { %v755_v1 = vsel %vm753_vm13, %v754_v60, %v752_v0  ;;  %v628_v8 = vadd.f32 %v627_v61, %v601_v58 }
 0x183   :  { %v849_v2 = vsel %vm848_vm11, %v832_v62, 0.0  ;;  %v815_v3 = vmul.f32 %v793_v63, %v755_v1 }
 0x184   :  { %850 = vadd.xlane.f32.xlu2 %v849_v2  ;;  %v652_v10 = vadd.f32 %v651_v5, %v628_v8 }
 0x185   :  { %v817_v4 = vadd.f32 1e-08, %v815_v3 }
 0x187   :  { %1223 = vrcp.f32 %v817_v4  ;;  %v844_v17 = vand.u32 2147483648, %v817_v4  ;;  %v842_v7 = vand.u32 2147483647, %v817_v4  ;;  %vm838_vm15 = vweird.f32 %v817_v4 }
 0x188   :  { %v699_v18 = vpop.f32.mrf.mxu2 }
 0x189   :  { %v675_v6 = vpop.f32.mrf.mxu3  ;;  %v845_v23 = vor.u32 1.1754944e-38, %v844_v17  ;;  %vm843_vm2 = vcmp.eq.f32.partialorder %v842_v7, 8.507059e+37 }
 0x18a   :  { %v676_v14 = vadd.f32 %v675_v6, %v652_v10 }
 0x18c   :  { %v700_v21 = vadd.f32 %v699_v18, %v676_v14 }
 0x18d   :  { %v1224_v9 = vpop.eup %1223 }
 0x18e   :  { %v834_v12 = vmul.f32 %v1224_v9, %v817_v4  ;;  %vm839_vm14 = vweird.f32 %v1224_v9 }
 0x18f   :  { %vm840_vm1 = vmor %vm838_vm15, %vm839_vm14 }
 0x190   :  { %v835_v15 = vsub.f32 1.0, %v834_v12 }
 0x191   :  { %v721_v20 = vpop.f32.mrf.mxu3 }
 0x192   :  { %v836_v13 = vmul.f32 %v1224_v9, %v835_v15  ;;  %v722_v24 = vadd.f32 %v721_v20, %v700_v21 }
 0x194   :  { %v837_v22 = vadd.f32 %v1224_v9, %v836_v13 }
 0x196   :  { %v841_v25 = vsel %vm840_vm1, %v1224_v9, %v837_v22 }
 0x197   :  { %v846_v26 = vsel %vm843_vm2, %v845_v23, %v841_v25 }
 0x198   :  { %v847_v27 = vmul.f32 %v846_v26, %v722_v24 }
 0x19a   :  { %v852_v28 = vsel %vm848_vm11, %v847_v27, 0.0 }
 0x19b   :  { %853 = vadd.xlane.f32.xlu2 %v852_v28 }
 0x1f7   :  { %v851_v29 = vpop.xlane.xlu2 %850 }
 0x1f8   :  { %v855_v30 = vadd.f32 1e-08, %v851_v29 }
 0x1fa   :  { %1225 = vrcp.f32 %v855_v30  ;;  %v868_v32 = vand.u32 2147483648, %v855_v30  ;;  %v866_v35 = vand.u32 2147483647, %v855_v30  ;;  %vm862_vm4 = vweird.f32 %v855_v30 }
 0x1fc   :  { %v869_v37 = vor.u32 1.1754944e-38, %v868_v32  ;;  %vm867_vm6 = vcmp.eq.f32.partialorder %v866_v35, 8.507059e+37 }
 0x200   :  { %v1226_v31 = vpop.eup %1225 }
 0x201   :  { %v858_v11 = vmul.f32 %v1226_v31, %v855_v30  ;;  %vm863_vm3 = vweird.f32 %v1226_v31 }
 0x202   :  { %vm864_vm5 = vmor %vm862_vm4, %vm863_vm3 }
 0x203   :  { %v859_v16 = vsub.f32 1.0, %v858_v11 }
 0x205   :  { %v860_v33 = vmul.f32 %v1226_v31, %v859_v16 }
 0x207   :  { %v861_v36 = vadd.f32 %v1226_v31, %v860_v33 }
 0x209   :  { %v865_v39 = vsel %vm864_vm5, %v1226_v31, %v861_v36 }
 0x20a   :  { %v870_v19 = vsel %vm867_vm6, %v869_v37, %v865_v39 }
 0x20b   :  { %v871_v40 = vmul.f32 %v870_v19, %v832_v62 }
 0x20d   :  { %v888_v42 = vsel %vm848_vm11, %v871_v40, 0 }
 0x20e   :  { %v907_v38 = vand.u32 4294901760, %v888_v42  ;;  %v854_v41 = vpop.xlane.xlu2 %853 }
 0x20f   :  { %v856_v43 = vadd.f32 1e-08, %v854_v41 }
 0x210   :  { %938 = vmatmul.f32.vlgmr.msra.gmra.mxu1 %v907_v38  ;;  %v908_v44 = vsub.f32 %v888_v42, %v907_v38 }
 0x211   :  { %1131 = vmatpush.msra.mxu1 %v1441_v49  ;;  %1227 = vrcp.f32 %v856_v43  ;;  %v883_v53 = vand.u32 2147483648, %v856_v43  ;;  %v881_v55 = vand.u32 2147483647, %v856_v43  ;;  %vm877_vm8 = vweird.f32 %v856_v43 }
 0x212   :  { %962 = vmatmul.f32.vlgmr.msrb.gmra.mxu2 %v908_v44  ;;  %v909_v45 = vand.u32 4294901760, %v908_v44 }
 0x213   :  { %1157 = vmatpush.msrb.mxu2 %v1082_v50  ;;  %v884_v50 = vor.u32 1.1754944e-38, %v883_v53  ;;  %vm882_vm10 = vcmp.eq.f32.partialorder %v881_v55, 8.507059e+37 }
 0x214   :  { %986 = vmatmul.f32.vlgmr.msrb.gmra.mxu3 %v909_v45  ;;  %v910_v46 = vsub.f32 %v908_v44, %v909_v45 }
 0x215   :  { %1179 = vmatpush.msrb.mxu3 %v1441_v49 }
 0x216   :  { %v911_v47 = vand.u32 4294901760, %v910_v46 }
 0x217   :  { %v1228_v48 = vpop.eup %1227 }
 0x218   :  { %1032 = vmatmul.f32.vlgmr.msrb.gmra.mxu1 %v907_v38  ;;  %v873_v51 = vmul.f32 %v1228_v48, %v856_v43  ;;  %912 = vmatmul.f32.vlgmr.msra.gmra.mxu0 %v911_v47  ;;  %vm878_vm7 = vweird.f32 %v1228_v48 }
 0x219   :  { %1108 = vmatpush.msra.mxu0 %v1445_v34  ;;  %vm879_vm9 = vmor %vm877_vm8, %vm878_vm7 }
 0x21a   :  { %v874_v52 = vsub.f32 1.0, %v873_v51 }
 0x21c   :  { %v875_v54 = vmul.f32 %v1228_v48, %v874_v52 }
 0x21e   :  { %v876_v56 = vadd.f32 %v1228_v48, %v875_v54 }
 0x220   :  { %1010 = vmatmul.f32.vlgmr.msrb.gmra.mxu0 %v907_v38  ;;  %v880_v57 = vsel %vm879_vm9, %v1228_v48, %v876_v56 }
 0x221   :  { %v885_v49 = vsel %vm882_vm10, %v884_v50, %v880_v57 }
 0x222   :  { %v886_v58 = vmul.f32 %v885_v49, %v847_v27 }
 0x224   :  { %v1037_v59 = vsel %vm848_vm11, %v886_v58, 0 }
 0x225   :  { %v1056_v60 = vand.u32 4294901760, %v1037_v59 }
 0x227   :  { %1087 = vmatmul.f32.vlgmr.msra.gmra.mxu3 %v1056_v60  ;;  %v1057_v61 = vsub.f32 %v1037_v59, %v1056_v60 }
 0x229   :  { %1111 = vmatmul.f32.vlgmr.msra.gmra.mxu0 %v1057_v61  ;;  %v1058_v34 = vand.u32 4294901760, %v1057_v61 }
 0x22b   :  { %1135 = vmatmul.f32.vlgmr.msra.gmra.mxu1 %v1058_v34  ;;  %v1059_v62 = vsub.f32 %v1057_v61, %v1058_v34 }
 0x22d   :  { %v1060_v63 = vand.u32 4294901760, %v1059_v62 }
 0x22f   :  { %1061 = vmatmul.f32.vlgmr.msra.gmra.mxu2 %v1060_v63  ;;  %1181 = vmatmul.f32.vlgmr.msrb.gmra.mxu3 %v1056_v60 }
 0x237   :  { %1159 = vmatmul.f32.vlgmr.msrb.gmra.mxu2 %v1056_v60 }
 0x28d   :  { %v939_v0 = vpop.f32.mrf.mxu1 }
 0x295   :  { %v913_v1 = vpop.f32.mrf.mxu0  ;;  %v963_v3 = vpop.f32.mrf.mxu2 }
 0x296   :  { %v940_v2 = vadd.f32 %v939_v0, %v913_v1  ;;  %v1033_v10 = vpop.f32.mrf.mxu1 }
 0x297   :  { %v987_v5 = vpop.f32.mrf.mxu3 }
 0x298   :  { %v964_v4 = vadd.f32 %v963_v3, %v940_v2 }
 0x29a   :  { %v988_v6 = vadd.f32 %v987_v5, %v964_v4 }
 0x29d   :  { %v1011_v8 = vpop.f32.mrf.mxu0 }
 0x29e   :  { %v1012_v9 = vadd.f32 %v1011_v8, %v988_v6 }
 0x2a0   :  { %v1034_v12 = vadd.f32 %v1033_v10, %v1012_v9 }
 0x2a2   :  { %1185 = vst.msk [vmem:[#allocation7] sm:$0xff] %vm61_vm0, %v1034_v12 }
 0x2a6   :  { %v1112_v13 = vpop.f32.mrf.mxu0 }
 0x2a8   :  { %v1136_v18 = vpop.f32.mrf.mxu1 }
 0x2aa   :  { %v1088_v14 = vpop.f32.mrf.mxu3 }
 0x2b2   :  { %v1062_v15 = vpop.f32.mrf.mxu2  ;;  %v1182_v23 = vpop.f32.mrf.mxu3 }
 0x2b3   :  { %v1089_v17 = vadd.f32 %v1088_v14, %v1062_v15 }
 0x2b5   :  { %v1113_v7 = vadd.f32 %v1112_v13, %v1089_v17 }
 0x2b7   :  { %v1137_v20 = vadd.f32 %v1136_v18, %v1113_v7 }
 0x2ba   :  { %v1160_v21 = vpop.f32.mrf.mxu2 }
 0x2bb   :  { %v1161_v22 = vadd.f32 %v1160_v21, %v1137_v20 }
 0x2bd   :  { %v1183_v24 = vadd.f32 %v1182_v23, %v1161_v22 }
 0x2bf   :  { %1186 = vst.msk [vmem:[#allocation7 + $0x8] sm:$0xff] %vm61_vm0, %v1183_v24 }
 0x2c0   :  { %1199 = dma.vmem_to_hbm [thread:$0]  %s1192_s24, 256, %s1194_s27, [#allocation4], %s1308_s20, %s1308_s20, %s1309_s21  }
 0x2c1   :  { %1305 = dma.done.wait [#allocation4], 256  }
 0x2c2   :  { %1306 = vsyncadd [#allocation4], 4294967040 }
 0x2c3   :  { %1204 = vsyncpa [#allocation3], 1 }
 0x2c4   :  { %1205 = vsyncpa [#allocation6], 1 }
 0x2c5   :  { %1206 = vsyncpa [#allocation4], 1 }

</bundles_post_ra>
